<compile_context>
chip_gen: v5e
topology: v5e:2x2
jax: 0.10.0
libtpu: 0.0.40
codegen_flags: <defaults>
</compile_context>

<pallas_src>
import functools
import math

import jax
import jax.numpy as jnp
from jax import lax
from jax.experimental import pallas as pl
from jax.experimental.pallas import tpu as pltpu

IN_DIM = 32
OUT_DIM = 16
H_DIM = max(16, (IN_DIM + OUT_DIM) // 2)  # 24, same rule as the PyTorch module
LN_EPS = 1e-5
_INV_SQRT2 = 1.0 / math.sqrt(2.0)
_MAX_TM = 4096  # (4096, 32) f32 input block = 512 KiB; total tiles are a few
                # MiB double-buffered — far under VMEM on v5e/v6e/v7x.


def _choose_tm(n_rows: int) -> int:
    """Row tile: multiple of 128 (lane-dense transposed compute/store).

    Small inputs -> a single block (no forced split on single-TC v5e/v6e);
    large inputs -> multiple 'parallel' steps that shard across v7x's 2 TCs.
    """
    tm = -(-n_rows // 128) * 128  # round up to a lane multiple
    return max(128, min(_MAX_TM, tm))


def _mlp_transform_kernel(x_ref, w1_ref, b1_ref, g_ref, be_ref, w2t_ref,
                          b2_ref, o_ref):
    # Linear 1 in f32 (MXU is massively under-utilized at these dims; bf16
    # casts would only add VALU pack ops and error).
    h = jnp.dot(x_ref[...], w1_ref[...],
                preferred_element_type=jnp.float32)          # (TM, H_DIM)

    # Transpose to lane-dense layout: batch rows on the 128-lane axis,
    # features (H_DIM=24) on the sublane axis.  XLU transpose -> idle slot.
    ht = jnp.transpose(h) + b1_ref[...]                      # (H_DIM, TM)

    # LayerNorm over the feature axis (now the sublane axis): biased variance,
    # eps added to the variance — identical to PyTorch nn.LayerNorm.
    mu = jnp.mean(ht, axis=0, keepdims=True)                 # (1, TM)
    d = ht - mu
    var = jnp.mean(d * d, axis=0, keepdims=True)             # (1, TM)
    hn = d * lax.rsqrt(var + LN_EPS)
    hn = hn * g_ref[...] + be_ref[...]                        # (H_DIM, TM)

    # GELU (exact erf form — PyTorch nn.GELU default), full lane occupancy.
    act = 0.5 * hn * (1.0 + lax.erf(hn * _INV_SQRT2))

    # Dropout is identity in eval mode.
    # TODO(synk): train-mode dropout (RNG mask) not implemented.

    # Linear 2, still lane-dense: y^T = W2 @ act^T  -> (OUT_DIM, TM).
    yt = jnp.dot(w2t_ref[...], act, preferred_element_type=jnp.float32)
    yt = yt + b2_ref[...]

    # torch.nan_to_num: NaN -> 0, +/-inf -> finfo max/min.
    o_ref[...] = jnp.nan_to_num(yt).astype(o_ref.dtype)


def _run_mlp(x2d, w1, b1, gamma, beta, w2t, b2, *, tm):
    """x2d: (N, IN_DIM) f32 -> (N, OUT_DIM) f32 via one pallas_call."""
    n = x2d.shape[0]
    grid = (pl.cdiv(n, tm),)
    yt = pl.pallas_call(
        _mlp_transform_kernel,
        out_shape=jax.ShapeDtypeStruct((OUT_DIM, n), jnp.float32),
        grid=grid,
        in_specs=[
            pl.BlockSpec((tm, IN_DIM), lambda i: (i, 0)),
            pl.BlockSpec((IN_DIM, H_DIM), lambda i: (0, 0)),   # w1  (in, h)
            pl.BlockSpec((H_DIM, 1), lambda i: (0, 0)),        # b1  column
            pl.BlockSpec((H_DIM, 1), lambda i: (0, 0)),        # gamma
            pl.BlockSpec((H_DIM, 1), lambda i: (0, 0)),        # beta
            pl.BlockSpec((OUT_DIM, H_DIM), lambda i: (0, 0)),  # w2^T (out, h)
            pl.BlockSpec((OUT_DIM, 1), lambda i: (0, 0)),      # b2  column
        ],
        out_specs=pl.BlockSpec((OUT_DIM, tm), lambda i: (0, i)),
        compiler_params=pltpu.CompilerParams(
            dimension_semantics=("parallel",)),
    )(x2d, w1, b1, gamma, beta, w2t, b2)
    # Lane-dense stores in the kernel; cheap wrapper-side transpose back.
    return yt.T


def make_params(key):
    """Deterministic init matching init_weights (xavier_uniform / zeros / ones).
    w1 stored (in, h); w2 stored transposed (out, h); biases/LN params stored
    as column vectors for the lane-dense (features-on-sublane) kernel layout.
    Everything f32."""
    k1, k2 = jax.random.split(key)

    def xavier(k, fan_in, fan_out, shape):
        a = math.sqrt(6.0 / (fan_in + fan_out))
        return jax.random.uniform(k, shape, jnp.float32, -a, a)

    return {
        "w1": xavier(k1, IN_DIM, H_DIM, (IN_DIM, H_DIM)),
        "b1": jnp.zeros((H_DIM, 1), jnp.float32),
        "gamma": jnp.ones((H_DIM, 1), jnp.float32),
        "beta": jnp.zeros((H_DIM, 1), jnp.float32),
        "w2t": xavier(k2, H_DIM, OUT_DIM, (OUT_DIM, H_DIM)),
        "b2": jnp.zeros((OUT_DIM, 1), jnp.float32),
    }


@jax.jit
def inter_level_transform(params, v_rotated, v_boundaries_stacked,
                          v_descriptor):
    """Applies the shared MLP transform to all three inputs (last dim IN_DIM),
    fused into a single pallas_call."""
    inputs = (v_rotated, v_boundaries_stacked, v_descriptor)
    flats = [x.reshape(-1, IN_DIM) for x in inputs]
    sizes = [f.shape[0] for f in flats]
    x_all = jnp.concatenate(flats, axis=0)          # negligible at these sizes
    tm = _choose_tm(x_all.shape[0])
    y_all = _run_mlp(x_all, params["w1"], params["b1"], params["gamma"],
                     params["beta"], params["w2t"], params["b2"], tm=tm)
    outs, off = [], 0
    for x, n in zip(inputs, sizes):
        outs.append(y_all[off:off + n].reshape(x.shape[:-1] + (OUT_DIM,)))
        off += n
    return tuple(outs)


def _reference(params, x):
    """Pure-JAX f32 reference of the same forward (sanity check only)."""
    flat = x.reshape(-1, IN_DIM).astype(jnp.float32)
    h = jnp.dot(flat, params["w1"],
                precision=lax.Precision.HIGHEST) + params["b1"][:, 0]
    mu = jnp.mean(h, axis=-1, keepdims=True)
    var = jnp.mean((h - mu) ** 2, axis=-1, keepdims=True)
    hn = (h - mu) * lax.rsqrt(var + LN_EPS)
    hn = hn * params["gamma"][:, 0] + params["beta"][:, 0]
    act = 0.5 * hn * (1.0 + lax.erf(hn * _INV_SQRT2))
    y = jnp.dot(act, params["w2t"].T,
                precision=lax.Precision.HIGHEST) + params["b2"][:, 0]
    return jnp.nan_to_num(y).reshape(x.shape[:-1] + (OUT_DIM,))


if __name__ == "__main__":
    key = jax.random.PRNGKey(0)
    kp, k1, k2, k3 = jax.random.split(key, 4)

    params = make_params(kp)

    # batch=2, seq=8, num_boundaries=4, feature dim = IN_DIM
    v_rotated = jax.random.normal(k1, (2, 8, IN_DIM), jnp.float32)
    v_boundaries_rotated_stacked = jax.random.normal(k2, (2, 8, 4, IN_DIM),
                                                     jnp.float32)
    v_descriptor_rotated = jax.random.normal(k3, (2, 8, IN_DIM), jnp.float32)

    out_main, out_bnd, out_desc = inter_level_transform(
        params, v_rotated, v_boundaries_rotated_stacked, v_descriptor_rotated)
    jax.block_until_ready((out_main, out_bnd, out_desc))

    assert out_main.shape == (2, 8, OUT_DIM)
    assert out_bnd.shape == (2, 8, 4, OUT_DIM)
    assert out_desc.shape == (2, 8, OUT_DIM)
    assert bool(jnp.isfinite(out_main).all())
    assert bool(jnp.isfinite(out_bnd).all())
    assert bool(jnp.isfinite(out_desc).all())

    # Numerical sanity check vs a pure-JAX reference.  The kernel runs in f32;
    # the tolerance only covers matmul-precision differences between the
    # Pallas MXU path and the XLA highest-precision reference path.
    for got, inp in ((out_main, v_rotated),
                     (out_bnd, v_boundaries_rotated_stacked),
                     (out_desc, v_descriptor_rotated)):
        want = _reference(params, inp)
        assert bool(jnp.allclose(got, want, atol=2e-2, rtol=2e-2)), "mismatch"

    print("KERNEL_OK")
</pallas_src>

<mosaic_0001>
module attributes {stable_mosaic.version = 11 : i64} {
  func.func @_mlp_transform_kernel(%arg0: i32, %arg1: memref<128x32xf32, #tpu.memory_space<vmem>>, %arg2: memref<32x24xf32, #tpu.memory_space<vmem>>, %arg3: memref<24x1xf32, #tpu.memory_space<vmem>>, %arg4: memref<24x1xf32, #tpu.memory_space<vmem>>, %arg5: memref<24x1xf32, #tpu.memory_space<vmem>>, %arg6: memref<16x24xf32, #tpu.memory_space<vmem>>, %arg7: memref<16x1xf32, #tpu.memory_space<vmem>>, %arg8: memref<16x128xf32, #tpu.memory_space<vmem>>) attributes {dimension_semantics = [#tpu.dimension_semantics<parallel>], iteration_bounds = array<i64: 1>, scalar_prefetch = 0 : i64, scratch_operands = 0 : i64, tpu.core_type = #tpu.core_type<tc>, window_params = [{transform_indices = @transform_0, window_bounds = array<i64: 128, 32>}, {pipeline_mode = #tpu.pipeline_mode<synchronous>, transform_indices = @transform_1, window_bounds = array<i64: 32, 24>}, {pipeline_mode = #tpu.pipeline_mode<synchronous>, transform_indices = @transform_2, window_bounds = array<i64: 24, 1>}, {pipeline_mode = #tpu.pipeline_mode<synchronous>, transform_indices = @transform_3, window_bounds = array<i64: 24, 1>}, {pipeline_mode = #tpu.pipeline_mode<synchronous>, transform_indices = @transform_4, window_bounds = array<i64: 24, 1>}, {pipeline_mode = #tpu.pipeline_mode<synchronous>, transform_indices = @transform_5, window_bounds = array<i64: 16, 24>}, {pipeline_mode = #tpu.pipeline_mode<synchronous>, transform_indices = @transform_6, window_bounds = array<i64: 16, 1>}, {transform_indices = @transform_7, window_bounds = array<i64: 16, 128>}]} {
    %c0 = arith.constant 0 : index
    %c0_0 = arith.constant 0 : index
    %0 = vector.load %arg1[%c0, %c0_0] : memref<128x32xf32, #tpu.memory_space<vmem>>, vector<128x32xf32>
    %c0_1 = arith.constant 0 : index
    %c0_2 = arith.constant 0 : index
    %1 = vector.load %arg2[%c0_1, %c0_2] : memref<32x24xf32, #tpu.memory_space<vmem>>, vector<32x24xf32>
    %cst = arith.constant dense<0.000000e+00> : vector<128x24xf32>
    %2 = tpu.matmul %0, %1, %cst {dimension_numbers = #tpu.dot_dimension_numbers<[1], [0], [0], [1], [0, 0, 1, 1], [], []>} : vector<128x32xf32>, vector<32x24xf32>, vector<128x24xf32> -> vector<128x24xf32>
    %3 = tpu.transpose %2, [1, 0] : vector<128x24xf32> -> vector<24x128xf32>
    %c0_3 = arith.constant 0 : index
    %c0_4 = arith.constant 0 : index
    %4 = vector.load %arg3[%c0_3, %c0_4] : memref<24x1xf32, #tpu.memory_space<vmem>>, vector<24x1xf32>
    %5 = vector.broadcast %4 : vector<24x1xf32> to vector<24x128xf32>
    %6 = arith.addf %3, %5 : vector<24x128xf32>
    %cst_5 = arith.constant dense<0.000000e+00> : vector<128xf32>
    %7 = vector.multi_reduction <add>, %6, %cst_5 [0] : vector<24x128xf32> to vector<128xf32>
    %8 = vector.shape_cast %7 : vector<128xf32> to vector<1x128xf32>
    %cst_6 = arith.constant 2.400000e+01 : f32
    %9 = vector.broadcast %cst_6 : f32 to vector<1x128xf32>
    %10 = arith.divf %8, %9 : vector<1x128xf32>
    %11 = vector.broadcast %10 : vector<1x128xf32> to vector<24x128xf32>
    %12 = arith.subf %6, %11 : vector<24x128xf32>
    %13 = arith.mulf %12, %12 : vector<24x128xf32>
    %cst_7 = arith.constant dense<0.000000e+00> : vector<128xf32>
    %14 = vector.multi_reduction <add>, %13, %cst_7 [0] : vector<24x128xf32> to vector<128xf32>
    %15 = vector.shape_cast %14 : vector<128xf32> to vector<1x128xf32>
    %cst_8 = arith.constant 2.400000e+01 : f32
    %16 = vector.broadcast %cst_8 : f32 to vector<1x128xf32>
    %17 = arith.divf %15, %16 : vector<1x128xf32>
    %cst_9 = arith.constant 9.99999974E-6 : f32
    %18 = vector.broadcast %cst_9 : f32 to vector<1x128xf32>
    %19 = arith.addf %17, %18 : vector<1x128xf32>
    %20 = math.rsqrt %19 : vector<1x128xf32>
    %21 = vector.broadcast %20 : vector<1x128xf32> to vector<24x128xf32>
    %22 = arith.mulf %12, %21 : vector<24x128xf32>
    %c0_10 = arith.constant 0 : index
    %c0_11 = arith.constant 0 : index
    %23 = vector.load %arg4[%c0_10, %c0_11] : memref<24x1xf32, #tpu.memory_space<vmem>>, vector<24x1xf32>
    %24 = vector.broadcast %23 : vector<24x1xf32> to vector<24x128xf32>
    %25 = arith.mulf %22, %24 : vector<24x128xf32>
    %c0_12 = arith.constant 0 : index
    %c0_13 = arith.constant 0 : index
    %26 = vector.load %arg5[%c0_12, %c0_13] : memref<24x1xf32, #tpu.memory_space<vmem>>, vector<24x1xf32>
    %27 = vector.broadcast %26 : vector<24x1xf32> to vector<24x128xf32>
    %28 = arith.addf %25, %27 : vector<24x128xf32>
    %cst_14 = arith.constant 5.000000e-01 : f32
    %29 = vector.broadcast %cst_14 : f32 to vector<24x128xf32>
    %30 = arith.mulf %29, %28 : vector<24x128xf32>
    %cst_15 = arith.constant 0.707106769 : f32
    %31 = vector.broadcast %cst_15 : f32 to vector<24x128xf32>
    %32 = arith.mulf %28, %31 : vector<24x128xf32>
    %33 = math.erf %32 : vector<24x128xf32>
    %cst_16 = arith.constant 1.000000e+00 : f32
    %34 = vector.broadcast %cst_16 : f32 to vector<24x128xf32>
    %35 = arith.addf %34, %33 : vector<24x128xf32>
    %36 = arith.mulf %30, %35 : vector<24x128xf32>
    %c0_17 = arith.constant 0 : index
    %c0_18 = arith.constant 0 : index
    %37 = vector.load %arg6[%c0_17, %c0_18] : memref<16x24xf32, #tpu.memory_space<vmem>>, vector<16x24xf32>
    %cst_19 = arith.constant dense<0.000000e+00> : vector<16x128xf32>
    %38 = tpu.matmul %37, %36, %cst_19 {dimension_numbers = #tpu.dot_dimension_numbers<[1], [0], [0], [1], [0, 0, 1, 1], [], []>} : vector<16x24xf32>, vector<24x128xf32>, vector<16x128xf32> -> vector<16x128xf32>
    %c0_20 = arith.constant 0 : index
    %c0_21 = arith.constant 0 : index
    %39 = vector.load %arg7[%c0_20, %c0_21] : memref<16x1xf32, #tpu.memory_space<vmem>>, vector<16x1xf32>
    %40 = vector.broadcast %39 : vector<16x1xf32> to vector<16x128xf32>
    %41 = arith.addf %38, %40 : vector<16x128xf32>
    %42 = arith.cmpf one, %41, %41 : vector<16x128xf32>
    %cst_22 = arith.constant 0.000000e+00 : f32
    %43 = vector.broadcast %cst_22 : f32 to vector<16x128xf32>
    %44 = arith.select %42, %43, %41 : vector<16x128xi1>, vector<16x128xf32>
    %cst_23 = arith.constant 0x7F800000 : f32
    %45 = vector.broadcast %cst_23 : f32 to vector<16x128xf32>
    %46 = arith.cmpf oeq, %44, %45 : vector<16x128xf32>
    %cst_24 = arith.constant 3.40282347E+38 : f32
    %47 = vector.broadcast %cst_24 : f32 to vector<16x128xf32>
    %48 = arith.select %46, %47, %44 : vector<16x128xi1>, vector<16x128xf32>
    %cst_25 = arith.constant 0xFF800000 : f32
    %49 = vector.broadcast %cst_25 : f32 to vector<16x128xf32>
    %50 = arith.cmpf oeq, %48, %49 : vector<16x128xf32>
    %cst_26 = arith.constant -3.40282347E+38 : f32
    %51 = vector.broadcast %cst_26 : f32 to vector<16x128xf32>
    %52 = arith.select %50, %51, %48 : vector<16x128xi1>, vector<16x128xf32>
    %c0_27 = arith.constant 0 : index
    %c0_28 = arith.constant 0 : index
    %53 = vector.load %arg8[%c0_27, %c0_28] : memref<16x128xf32, #tpu.memory_space<vmem>>, vector<16x128xf32>
    tpu.vector_store %arg8[%c0_27, %c0_28], %52 {strides = array<i32>} : memref<16x128xf32, #tpu.memory_space<vmem>>, vector<16x128xf32>,
    return
  }
  func.func @transform_0(%arg0: i32) -> (i32, i32) {
    %c0_i32 = arith.constant 0 : i32
    %c0_i32_0 = arith.constant 0 : i32
    return %arg0, %c0_i32 : i32, i32
  }
  func.func @transform_1(%arg0: i32) -> (i32, i32) {
    %c0_i32 = arith.constant 0 : i32
    %c0_i32_0 = arith.constant 0 : i32
    %c0_i32_1 = arith.constant 0 : i32
    return %c0_i32, %c0_i32_0 : i32, i32
  }
  func.func @transform_2(%arg0: i32) -> (i32, i32) {
    %c0_i32 = arith.constant 0 : i32
    %c0_i32_0 = arith.constant 0 : i32
    %c0_i32_1 = arith.constant 0 : i32
    return %c0_i32, %c0_i32_0 : i32, i32
  }
  func.func @transform_3(%arg0: i32) -> (i32, i32) {
    %c0_i32 = arith.constant 0 : i32
    %c0_i32_0 = arith.constant 0 : i32
    %c0_i32_1 = arith.constant 0 : i32
    return %c0_i32, %c0_i32_0 : i32, i32
  }
  func.func @transform_4(%arg0: i32) -> (i32, i32) {
    %c0_i32 = arith.constant 0 : i32
    %c0_i32_0 = arith.constant 0 : i32
    %c0_i32_1 = arith.constant 0 : i32
    return %c0_i32, %c0_i32_0 : i32, i32
  }
  func.func @transform_5(%arg0: i32) -> (i32, i32) {
    %c0_i32 = arith.constant 0 : i32
    %c0_i32_0 = arith.constant 0 : i32
    %c0_i32_1 = arith.constant 0 : i32
    return %c0_i32, %c0_i32_0 : i32, i32
  }
  func.func @transform_6(%arg0: i32) -> (i32, i32) {
    %c0_i32 = arith.constant 0 : i32
    %c0_i32_0 = arith.constant 0 : i32
    %c0_i32_1 = arith.constant 0 : i32
    return %c0_i32, %c0_i32_0 : i32, i32
  }
  func.func @transform_7(%arg0: i32) -> (i32, i32) {
    %c0_i32 = arith.constant 0 : i32
    %c0_i32_0 = arith.constant 0 : i32
    return %c0_i32, %arg0 : i32, i32
  }
}

</mosaic_0001>

<bundles_post_ra>
// kernel: inter_level_transform.1
= control target key start
LH: loop header
LB: loop body
LE: loop exit
PB: predicated region body
PF: predicated region fallthrough
CT: control target
= control target key end

     0   :  { %vm46_vm0 = vcmask 261120   ;;  %v542_v8 = vmov 0   ;;  %v543_v51 = vmov 24.0   ;;  %s733_s1 = inlined_call_operand.vmem [shape: f32[32,24], index: 1, kind: input, shape index: {}]   ;;  %s734_s0 = inlined_call_operand.vmem [shape: f32[96,32], index: 0, kind: input, shape index: {}]   ;;  %s735_s2 = inlined_call_operand.vmem [shape: f32[24,1], index: 2, kind: input, shape index: {}]   ;;  %s736_s4 = inlined_call_operand.vmem [shape: f32[24,1], index: 4, kind: input, shape index: {}]   ;;  %s737_s6 = inlined_call_operand.vmem [shape: f32[16,1], index: 6, kind: input, shape index: {}]   ;;  %s738_s3 = inlined_call_operand.vmem [shape: f32[24,1], index: 3, kind: input, shape index: {}]   ;;  %s739_s5 = inlined_call_operand.vmem [shape: f32[16,24], index: 5, kind: input, shape index: {}]   ;;  %s740_s7 = inlined_call_operand.vmem [shape: f32[16,96], index: 7, kind: output, shape index: {}]  }
   0x1   :  { %v45_v0 = vld [vmem:[%s733_s1 + $0x18] sm:$0xff]  ;;  %v44_v1 = vld [vmem:[%s733_s1 + $0x10] sm:$0xff]  ;;  %v43_v2 = vld [vmem:[%s733_s1 + $0x8] sm:$0xff]  ;;  %530 = vset.pattern.permute.xlu1 %v542_v8  ;;  %529 = vset.pattern.permute.xlu0 %v542_v8  ;;  %532 = vrcp.f32 %v543_v51 }
   0x2   :  { %107 = vmatpush.msra.mxu0 %v45_v0  ;;  %515 = vmatpush.msra.mxu1 %v45_v0  ;;  %v42_v3 = vld [vmem:[%s733_s1] sm:$0xff]  ;;  %v31_v5 = vld [vmem:[%s734_s0 + $0x28] sm:$0xff]  ;;  %v32_v6 = vld [vmem:[%s734_s0 + $0x30] sm:$0xff] }
   0x3   :  { %516 = vmatpush.msra.mxu2 %v45_v0  ;;  %517 = vmatpush.msra.mxu3 %v45_v0  ;;  %v26_v4 = vld [vmem:[%s734_s0] sm:$0xff]  ;;  %v194_v7 = vld [vmem:[%s735_s2 + $0x10] sm:$0xff]  ;;  %v37_v9 = vld [vmem:[%s734_s0 + $0x58] sm:$0xff] }
   0x4   :  { %108 = vmatpush.msra.mxu0 %v44_v1  ;;  %518 = vmatpush.msra.mxu1 %v44_v1  ;;  %v27_v10 = vld [vmem:[%s734_s0 + $0x8] sm:$0xff]  ;;  %v33_v11 = vld [vmem:[%s734_s0 + $0x38] sm:$0xff]  ;;  %v38_v12 = vld [vmem:[%s734_s0 + $0x60] sm:$0xff] }
   0x5   :  { %519 = vmatpush.msra.mxu2 %v44_v1  ;;  %520 = vmatpush.msra.mxu3 %v44_v1  ;;  %v28_v13 = vld [vmem:[%s734_s0 + $0x10] sm:$0xff]  ;;  %v34_v14 = vld [vmem:[%s734_s0 + $0x40] sm:$0xff]  ;;  %v39_v15 = vld [vmem:[%s734_s0 + $0x68] sm:$0xff] }
   0x6   :  { %109 = vmatpush.msra.mxu0 %v43_v2  ;;  %521 = vmatpush.msra.mxu1 %v43_v2  ;;  %v29_v16 = vld [vmem:[%s734_s0 + $0x18] sm:$0xff]  ;;  %v35_v17 = vld [vmem:[%s734_s0 + $0x48] sm:$0xff]  ;;  %v40_v18 = vld [vmem:[%s734_s0 + $0x70] sm:$0xff] }
   0x7   :  { %522 = vmatpush.msra.mxu2 %v43_v2  ;;  %523 = vmatpush.msra.mxu3 %v43_v2  ;;  %v30_v19 = vld [vmem:[%s734_s0 + $0x20] sm:$0xff]  ;;  %v36_v20 = vld [vmem:[%s734_s0 + $0x50] sm:$0xff]  ;;  %v41_v21 = vld [vmem:[%s734_s0 + $0x78] sm:$0xff]  ;;  %v533_v53 = vpop.eup %532 }
   0x8   :  { %110 = vmatpush.msra.mxu0 %v42_v3  ;;  %524 = vmatpush.msra.mxu1 %v42_v3  ;;  %v192_v22 = vld [vmem:[%s735_s2] sm:$0xff]  ;;  %v193_v24 = vld [vmem:[%s735_s2 + $0x8] sm:$0xff]  ;;  %v281_v25 = vld [vmem:[%s736_s4 + $0x10] sm:$0xff]  ;;  %v222_v56 = vmul.f32 24.0, %v533_v53  ;;  %vm226_vm1 = vweird.f32 %v533_v53 }
   0x9   :  { %494 = vmatmul.msk.f32.vlgmr.msra.gmra.mxu0 %vm46_vm0, %v26_v4  ;;  %525 = vmatpush.msra.mxu2 %v42_v3  ;;  %v280_v27 = vld [vmem:[%s736_s4 + $0x8] sm:$0xff]  ;;  %v434_v29 = vld [vmem:[%s737_s6] sm:$0xff]  ;;  %v260_v36 = vld [vmem:[%s738_s3 + $0x10] sm:$0xff] }
   0xa   :  { %499 = vmatmul.msk.f32.vlgmr.msra.gmra.mxu1 %vm46_vm0, %v31_v5  ;;  %500 = vmatmul.msk.f32.vlgmr.msra.gmra.mxu2 %vm46_vm0, %v32_v6  ;;  %v259_v38 = vld [vmem:[%s738_s3 + $0x8] sm:$0xff]  ;;  %v258_v41 = vld [vmem:[%s738_s3] sm:$0xff]  ;;  %v223_v61 = vsub.f32 1.0, %v222_v56 }
   0xb   :  { %526 = vmatpush.msra.mxu3 %v42_v3  ;;  %207 = vperm.xlu1 %530, %v194_v7   ;;  %v279_v43 = vld [vmem:[%s736_s4] sm:$0xff]  ;;  %v435_v44 = vld [vmem:[%s737_s6 + $0x8] sm:$0xff] }
   0xc   :  { %505 = vmatmul.msk.f32.vlgmr.msra.gmra.mxu3 %vm46_vm0, %v37_v9  ;;  %531 = vset.pattern.permute.xlu2 %v542_v8  ;;  %v224_v0 = vmul.f32 %v533_v53, %v223_v61 }
   0xd   :  { %197 = vperm.xlu0 %529, %v192_v22   ;;  %273 = vperm.xlu2 %531, %v260_v36  }
   0xe   :  { %v225_v3 = vadd.f32 %v533_v53, %v224_v0 }
  0x10   :  { %v227_v6 = vsel %vm226_vm1, %v533_v53, %v225_v3  ;;  %vm446_vm1 = vcmask 195584  }
  0x11   :  { %495 = vmatmul.msk.f32.gmra.mxu0 %vm46_vm0, %v27_v10 }
  0x12   :  { %501 = vmatmul.msk.f32.gmra.mxu2 %vm46_vm0, %v33_v11 }
  0x14   :  { %506 = vmatmul.msk.f32.gmra.mxu3 %vm46_vm0, %v38_v12 }
  0x15   :  { %202 = vperm.xlu0 %529, %v193_v24   ;;  %268 = vperm.xlu2 %531, %v259_v38  }
  0x19   :  { %496 = vmatmul.msk.f32.gmra.mxu0 %vm46_vm0, %v28_v13 }
  0x1a   :  { %502 = vmatmul.msk.f32.gmra.mxu2 %vm46_vm0, %v34_v14 }
  0x1c   :  { %507 = vmatmul.msk.f32.gmra.mxu3 %vm46_vm0, %v39_v15 }
  0x1d   :  { %294 = vperm.xlu0 %529, %v281_v25   ;;  %263 = vperm.xlu2 %531, %v258_v41  }
  0x21   :  { %497 = vmatmul.msk.f32.gmra.mxu0 %vm46_vm0, %v29_v16 }
  0x22   :  { %503 = vmatmul.msk.f32.gmra.mxu2 %vm46_vm0, %v35_v17 }
  0x24   :  { %508 = vmatmul.msk.f32.gmra.mxu3 %vm46_vm0, %v40_v18 }
  0x25   :  { %289 = vperm.xlu0 %529, %v280_v27   ;;  %284 = vperm.xlu2 %531, %v279_v43  }
  0x29   :  { %498 = vmatmul.msk.f32.gmra.mxu0 %vm46_vm0, %v30_v19 }
  0x2a   :  { %504 = vmatmul.msk.f32.gmra.mxu2 %vm46_vm0, %v36_v20 }
  0x2c   :  { %509 = vmatmul.msk.f32.gmra.mxu3 %vm46_vm0, %v41_v21 }
  0x2d   :  { %438 = vperm.xlu0 %529, %v434_v29   ;;  %443 = vperm.xlu2 %531, %v435_v44  }
  0x67   :  { %v274_v21 = vpop.permute.xlu2 %273 }
  0x7d   :  { %v208_v48 = vpop.permute.xlu1 %207 }
  0x7f   :  { %v198_v50 = vpop.permute.xlu0 %197 }
  0x86   :  { %v112_v23 = vpop.f32.mrf.mxu0 }
  0x87   :  { %160 = vxpose.xlu1.b32.start [1/16] (narrow) %v112_v23, 24  ;;  %v127_v32 = vpop.f32.mrf.mxu1  ;;  %v203_v54 = vpop.permute.xlu0 %202 }
  0x8d   :  { %v130_v33 = vpop.f32.mrf.mxu2 }
  0x8e   :  { %v115_v26 = vpop.f32.mrf.mxu0 }
  0x8f   :  { %161 = vxpose.xlu1.b32.cont [2/16] (narrow) %v115_v26, 24  ;;  %v145_v40 = vpop.f32.mrf.mxu3  ;;  %v269_v26 = vpop.permute.xlu2 %268 }
  0x95   :  { %v133_v34 = vpop.f32.mrf.mxu2 }
  0x96   :  { %v118_v28 = vpop.f32.mrf.mxu0 }
  0x97   :  { %162 = vxpose.xlu1.b32.cont [3/16] (narrow) %v118_v28, 24  ;;  %v148_v42 = vpop.f32.mrf.mxu3 }
  0x9d   :  { %v136_v35 = vpop.f32.mrf.mxu2 }
  0x9e   :  { %v121_v30 = vpop.f32.mrf.mxu0 }
  0x9f   :  { %163 = vxpose.xlu1.b32.cont [4/16] (narrow) %v121_v30, 24  ;;  %v151_v45 = vpop.f32.mrf.mxu3  ;;  %v295_v30 = vpop.permute.xlu0 %294 }
  0xa5   :  { %v139_v37 = vpop.f32.mrf.mxu2 }
  0xa6   :  { %v124_v31 = vpop.f32.mrf.mxu0 }
  0xa7   :  { %164 = vxpose.xlu1.b32.cont [5/16] (narrow) %v124_v31, 24  ;;  %v154_v46 = vpop.f32.mrf.mxu3 }
  0xad   :  { %v142_v39 = vpop.f32.mrf.mxu2 }
  0xaf   :  { %165 = vxpose.xlu1.b32.cont [6/16] (narrow) %v127_v32, 24  ;;  %v157_v47 = vpop.f32.mrf.mxu3  ;;  %v264_v32 = vpop.permute.xlu2 %263 }
  0xb7   :  { %166 = vxpose.xlu1.b32.cont [7/16] (narrow) %v130_v33, 24  ;;  %v285_v43 = vpop.permute.xlu2 %284 }
  0xbf   :  { %167 = vxpose.xlu1.b32.cont [8/16] (narrow) %v133_v34, 24 }
  0xc7   :  { %168 = vxpose.xlu1.b32.cont [9/16] (narrow) %v136_v35, 24 }
  0xcf   :  { %169 = vxpose.xlu1.b32.cont [10/16] (narrow) %v139_v37, 24 }
  0xd7   :  { %170 = vxpose.xlu1.b32.cont [11/16] (narrow) %v142_v39, 24 }
  0xdf   :  { %171 = vxpose.xlu1.b32.cont [12/16] (narrow) %v145_v40, 24 }
  0xe7   :  { %172 = vxpose.xlu1.b32.cont [13/16] (narrow) %v148_v42, 24  ;;  %v290_v42 = vpop.permute.xlu0 %289 }
  0xef   :  { %173 = vxpose.xlu1.b32.cont [14/16] (narrow) %v151_v45, 24 }
  0xf7   :  { %174 = vxpose.xlu1.b32.cont [15/16] (narrow) %v154_v46, 24 }
  0xff   :  { %175 = vxpose.xlu1.b32.end [16/16] (narrow) %v157_v47, 24 }
 0x12b   :  { %v176_v49 = vpop.trf.xlu1 }
 0x12c   :  { %v210_v57 = vadd.f32 %v198_v50, %v176_v49 }
 0x133   :  { %v177_v52 = vpop.trf.xlu1 }
 0x134   :  { %v211_v55 = vadd.f32 %v203_v54, %v177_v52 }
 0x136   :  { %v213_v59 = vadd.f32 %v211_v55, %v210_v57 }
 0x13b   :  { %v178_v58 = vpop.trf.xlu1 }
 0x13c   :  { %v212_v60 = vadd.f32 %v208_v48, %v178_v58 }
 0x13e   :  { %v214_v62 = vadd.f32 %v213_v59, %v212_v60 }
 0x140   :  { %v215_v63 = vrot.slane %v214_v62, 4 }
 0x142   :  { %v216_v1 = vadd.f32 %v215_v63, %v214_v62 }
 0x144   :  { %v217_v2 = vrot.slane %v216_v1, 2 }
 0x146   :  { %v218_v4 = vadd.f32 %v217_v2, %v216_v1 }
 0x148   :  { %v219_v5 = vrot.slane %v218_v4, 1 }
 0x14a   :  { %v220_v7 = vadd.f32 %v219_v5, %v218_v4 }
 0x14c   :  { %v228_v8 = vmul.f32 %v227_v6, %v220_v7 }
 0x14e   :  { %v229_v9 = vsub.f32 %v210_v57, %v228_v8  ;;  %v230_v10 = vsub.f32 %v211_v55, %v228_v8  ;;  %v231_v11 = vsub.f32 %v212_v60, %v228_v8 }
 0x150   :  { %v232_v12 = vmul.f32 %v229_v9, %v229_v9  ;;  %v233_v13 = vmul.f32 %v230_v10, %v230_v10  ;;  %v234_v14 = vmul.f32 %v231_v11, %v231_v11 }
 0x152   :  { %v235_v15 = vadd.f32 %v233_v13, %v232_v12 }
 0x154   :  { %v236_v16 = vadd.f32 %v235_v15, %v234_v14 }
 0x156   :  { %v237_v17 = vrot.slane %v236_v16, 4 }
 0x158   :  { %v238_v18 = vadd.f32 %v237_v17, %v236_v16 }
 0x15a   :  { %v239_v19 = vrot.slane %v238_v18, 2 }
 0x15c   :  { %v240_v20 = vadd.f32 %v239_v19, %v238_v18 }
 0x15e   :  { %v241_v22 = vrot.slane %v240_v20, 1 }
 0x160   :  { %v242_v23 = vadd.f32 %v241_v22, %v240_v20 }
 0x162   :  { %v243_v24 = vmul.f32 %v242_v23, %v227_v6 }
 0x164   :  { %v244_v25 = vadd.f32 1e-05, %v243_v24 }
 0x166   :  { %534 = vrsqrt.f32 %v244_v25  ;;  %vm251_vm3 = vweird.f32 %v244_v25 }
 0x16c   :  { %v535_v27 = vpop.eup %534 }
 0x16d   :  { %v246_v28 = vmul.f32 %v535_v27, %v244_v25  ;;  %vm252_vm2 = vweird.f32 %v535_v27 }
 0x16e   :  { %vm253_vm4 = vmor %vm251_vm3, %vm252_vm2 }
 0x16f   :  { %v247_v29 = vmul.f32 %v535_v27, %v246_v28 }
 0x171   :  { %v248_v31 = vmul.f32 0.5, %v247_v29 }
 0x173   :  { %v249_v33 = vsub.f32 1.5, %v248_v31 }
 0x175   :  { %v250_v34 = vmul.f32 %v535_v27, %v249_v33 }
 0x177   :  { %v254_v35 = vsel %vm253_vm4, %v535_v27, %v250_v34 }
 0x178   :  { %v257_v36 = vmul.f32 %v254_v35, %v231_v11  ;;  %v256_v37 = vmul.f32 %v254_v35, %v230_v10  ;;  %v255_v38 = vmul.f32 %v254_v35, %v229_v9 }
 0x17a   :  { %v278_v39 = vmul.f32 %v274_v21, %v257_v36  ;;  %v277_v40 = vmul.f32 %v269_v26, %v256_v37  ;;  %v276_v41 = vmul.f32 %v264_v32, %v255_v38 }
 0x17c   :  { %v693_v44 = vadd.f32 %v295_v30, %v278_v39  ;;  %v695_v45 = vadd.f32 %v290_v42, %v277_v40  ;;  %v697_v46 = vadd.f32 %v285_v43, %v276_v41 }
 0x17e   :  { %v700_v47 = vmul.f32 0.70710677, %v693_v44  ;;  %v703_v48 = vmul.f32 0.70710677, %v695_v45  ;;  %v706_v49 = vmul.f32 0.70710677, %v697_v46 }
 0x180   :  { %v386_v50 = vmul.f32 %v700_v47, %v700_v47  ;;  %v346_v51 = vmul.f32 %v703_v48, %v703_v48  ;;  %v306_v52 = vmul.f32 %v706_v49, %v706_v49 }
 0x182   :  { %v387_v53 = vmin.f32 %v386_v50, 16.0  ;;  %v347_v54 = vmin.f32 %v346_v51, 16.0  ;;  %v307_v55 = vmin.f32 %v306_v52, 16.0 }
 0x184   :  { %v388_v56 = vmul.f32 2.1237322e-06, %v387_v53  ;;  %v399_v57 = vmul.f32 3.8918573e-05, %v387_v53  ;;  %v348_v58 = vmul.f32 2.1237322e-06, %v347_v54 }
 0x185   :  { %v308_v59 = vmul.f32 2.1237322e-06, %v307_v55  ;;  %v359_v60 = vmul.f32 3.8918573e-05, %v347_v54  ;;  %v319_v61 = vmul.f32 3.8918573e-05, %v307_v55 }
 0x186   :  { %v389_v62 = vadd.f32 0.00028619796, %v388_v56  ;;  %v400_v63 = vadd.f32 0.001143296, %v399_v57  ;;  %v349_v0 = vadd.f32 0.00028619796, %v348_v58 }
 0x187   :  { %v309_v1 = vadd.f32 0.00028619796, %v308_v59  ;;  %v360_v2 = vadd.f32 0.001143296, %v359_v60  ;;  %v320_v3 = vadd.f32 0.001143296, %v319_v61 }
 0x188   :  { %v390_v4 = vmul.f32 %v389_v62, %v387_v53  ;;  %v401_v5 = vmul.f32 %v400_v63, %v387_v53  ;;  %v350_v6 = vmul.f32 %v349_v0, %v347_v54 }
 0x189   :  { %v310_v7 = vmul.f32 %v309_v1, %v307_v55  ;;  %v361_v8 = vmul.f32 %v360_v2, %v347_v54  ;;  %v321_v9 = vmul.f32 %v320_v3, %v307_v55 }
 0x18a   :  { %v391_v10 = vadd.f32 0.0036580483, %v390_v4  ;;  %v402_v11 = vadd.f32 0.014752088, %v401_v5  ;;  %v351_v12 = vadd.f32 0.0036580483, %v350_v6 }
 0x18b   :  { %v311_v13 = vadd.f32 0.0036580483, %v310_v7  ;;  %v362_v14 = vadd.f32 0.014752088, %v361_v8  ;;  %v322_v15 = vadd.f32 0.014752088, %v321_v9 }
 0x18c   :  { %v392_v16 = vmul.f32 %v391_v10, %v387_v53  ;;  %v403_v17 = vmul.f32 %v402_v11, %v387_v53  ;;  %v352_v18 = vmul.f32 %v351_v12, %v347_v54 }
 0x18d   :  { %v312_v19 = vmul.f32 %v311_v13, %v307_v55  ;;  %v363_v20 = vmul.f32 %v362_v14, %v347_v54  ;;  %v323_v21 = vmul.f32 %v322_v15, %v307_v55 }
 0x18e   :  { %v393_v22 = vadd.f32 0.05243302, %v392_v16  ;;  %v404_v23 = vadd.f32 0.112945676, %v403_v17  ;;  %v353_v24 = vadd.f32 0.05243302, %v352_v18 }
 0x18f   :  { %v364_v25 = vadd.f32 0.112945676, %v363_v20  ;;  %v324_v26 = vadd.f32 0.112945676, %v323_v21  ;;  %v313_v28 = vadd.f32 0.05243302, %v312_v19 }
 0x190   :  { %v405_v27 = vmul.f32 %v404_v23, %v387_v53  ;;  %v394_v29 = vmul.f32 %v393_v22, %v387_v53  ;;  %v354_v33 = vmul.f32 %v353_v24, %v347_v54 }
 0x191   :  { %v365_v30 = vmul.f32 %v364_v25, %v347_v54  ;;  %v325_v31 = vmul.f32 %v324_v26, %v307_v55  ;;  %v314_v37 = vmul.f32 %v313_v28, %v307_v55 }
 0x192   :  { %v406_v32 = vadd.f32 0.4994258, %v405_v27  ;;  %v395_v38 = vadd.f32 0.18741608, %v394_v29  ;;  %v355_v42 = vadd.f32 0.18741608, %v354_v33 }
 0x193   :  { %v366_v34 = vadd.f32 0.4994258, %v365_v30  ;;  %v326_v35 = vadd.f32 0.4994258, %v325_v31  ;;  %v315_v51 = vadd.f32 0.18741608, %v314_v37 }
 0x194   :  { %v407_v36 = vmul.f32 %v406_v32, %v387_v53  ;;  %v396_v52 = vmul.f32 %v395_v38, %v387_v53  ;;  %v356_v56 = vmul.f32 %v355_v42, %v347_v54  ;;  %v302_v30 = vmul.f32 0.5, %v693_v44  ;;  %v433_v44 = vld [vmem:[%s739_s5 + $0x8] sm:$0xff] }
 0x195   :  { %v367_v39 = vmul.f32 %v366_v34, %v347_v54  ;;  %v327_v40 = vmul.f32 %v326_v35, %v307_v55  ;;  %v316_v57 = vmul.f32 %v315_v51, %v307_v55  ;;  %v301_v35 = vmul.f32 0.5, %v695_v45  ;;  %v439_v45 = vpop.permute.xlu0 %438 }
 0x196   :  { %v408_v41 = vadd.f32 1.0, %v407_v36  ;;  %v397_v58 = vadd.f32 1.1283791, %v396_v52  ;;  %v357_v62 = vadd.f32 1.1283791, %v356_v56  ;;  %v300_v37 = vmul.f32 0.5, %v697_v46 }
 0x197   :  { %v368_v43 = vadd.f32 1.0, %v367_v39  ;;  %v328_v50 = vadd.f32 1.0, %v327_v40  ;;  %v317_v1 = vadd.f32 1.1283791, %v316_v57  ;;  %v432_v39 = vld [vmem:[%s739_s5] sm:$0xff] }
 0x198   :  { %536 = vrcp.f32 %v408_v41  ;;  %v398_v2 = vmul.f32 %v397_v58, %v700_v47  ;;  %v420_v4 = vand.u32 2147483648, %v408_v41  ;;  %vm414_vm5 = vweird.f32 %v408_v41 }
 0x199   :  { %538 = vrcp.f32 %v368_v43  ;;  %v418_v5 = vand.u32 2147483647, %v408_v41  ;;  %v358_v54 = vmul.f32 %v357_v62, %v703_v48  ;;  %v380_v55 = vand.u32 2147483648, %v368_v43 }
 0x19a   :  { %540 = vrcp.f32 %v328_v50  ;;  %v378_v9 = vand.u32 2147483647, %v368_v43  ;;  %v421_v12 = vor.u32 1.1754944e-38, %v420_v4  ;;  %vm374_vm8 = vweird.f32 %v368_v43 }
 0x19b   :  { %v340_v13 = vand.u32 2147483648, %v328_v50  ;;  %v338_v15 = vand.u32 2147483647, %v328_v50  ;;  %vm419_vm11 = vcmp.eq.f32.partialorder %v418_v5, 8.507059e+37  ;;  %v381_v17 = vor.u32 1.1754944e-38, %v380_v55 }
 0x19c   :  { %vm334_vm13 = vweird.f32 %v328_v50  ;;  %vm379_vm14 = vcmp.eq.f32.partialorder %v378_v9, 8.507059e+37  ;;  %v318_v23 = vmul.f32 %v317_v1, %v706_v49 }
 0x19d   :  { %v341_v22 = vor.u32 1.1754944e-38, %v340_v13  ;;  %vm339_vm0 = vcmp.eq.f32.partialorder %v338_v15, 8.507059e+37 }
 0x19e   :  { %v537_v59 = vpop.eup %536 }
 0x19f   :  { %v539_v60 = vpop.eup %538  ;;  %v410_v61 = vmul.f32 %v537_v59, %v408_v41  ;;  %vm415_vm6 = vweird.f32 %v537_v59 }
 0x1a0   :  { %v370_v63 = vmul.f32 %v539_v60, %v368_v43  ;;  %v541_v0 = vpop.eup %540  ;;  %vm375_vm7 = vweird.f32 %v539_v60  ;;  %vm416_vm9 = vmor %vm414_vm5, %vm415_vm6  ;;  %v444_v43 = vpop.permute.xlu2 %443 }
 0x1a1   :  { %v411_v3 = vsub.f32 1.0, %v410_v61  ;;  %v330_v53 = vmul.f32 %v541_v0, %v328_v50  ;;  %vm335_vm10 = vweird.f32 %v541_v0  ;;  %vm376_vm12 = vmor %vm374_vm8, %vm375_vm7 }
 0x1a2   :  { %v371_v6 = vsub.f32 1.0, %v370_v63  ;;  %vm336_vm15 = vmor %vm334_vm13, %vm335_vm10 }
 0x1a3   :  { %v412_v7 = vmul.f32 %v537_v59, %v411_v3  ;;  %v331_v10 = vsub.f32 1.0, %v330_v53 }
 0x1a4   :  { %v372_v8 = vmul.f32 %v539_v60, %v371_v6 }
 0x1a5   :  { %v413_v11 = vadd.f32 %v537_v59, %v412_v7  ;;  %v332_v14 = vmul.f32 %v541_v0, %v331_v10 }
 0x1a6   :  { %v373_v47 = vadd.f32 %v539_v60, %v372_v8 }
 0x1a7   :  { %v417_v16 = vsel %vm416_vm9, %v537_v59, %v413_v11  ;;  %v333_v19 = vadd.f32 %v541_v0, %v332_v14 }
 0x1a8   :  { %v422_v48 = vsel %vm419_vm11, %v421_v12, %v417_v16  ;;  %v377_v18 = vsel %vm376_vm12, %v539_v60, %v373_v47 }
 0x1a9   :  { %v423_v20 = vmul.f32 %v422_v48, %v398_v2  ;;  %v382_v21 = vsel %vm379_vm14, %v381_v17, %v377_v18  ;;  %v337_v25 = vsel %vm336_vm15, %v541_v0, %v333_v19 }
 0x1aa   :  { %v383_v24 = vmul.f32 %v382_v21, %v358_v54  ;;  %v342_v27 = vsel %vm339_vm0, %v341_v22, %v337_v25 }
 0x1ab   :  { %v512_v26 = vclamps-f32 %v423_v20, 1.0  ;;  %v343_v29 = vmul.f32 %v342_v27, %v318_v23 }
 0x1ac   :  { %v511_v28 = vclamps-f32 %v383_v24, 1.0 }
 0x1ad   :  { %v428_v31 = vadd.f32 1.0, %v512_v26  ;;  %v510_v33 = vclamps-f32 %v343_v29, 1.0 }
 0x1ae   :  { %v427_v32 = vadd.f32 1.0, %v511_v28 }
 0x1af   :  { %v431_v34 = vmul.f32 %v428_v31, %v302_v30  ;;  %v426_v36 = vadd.f32 1.0, %v510_v33 }
 0x1b0   :  { %v430_v49 = vmul.f32 %v427_v32, %v301_v35 }
 0x1b1   :  { %466 = vmatpush.msrb.mxu1 %v431_v34  ;;  %v429_v38 = vmul.f32 %v426_v36, %v300_v37 }
 0x1b3   :  { %467 = vmatpush.msrb.mxu1 %v430_v49 }
 0x1b5   :  { %468 = vmatpush.msrb.mxu1 %v429_v38 }
 0x1b6   :  { %513 = vmatmul.msk.f32.vlgmr.msrb.gmra.mxu1 %vm446_vm1, %v432_v39 }
 0x1be   :  { %514 = vmatmul.msk.f32.gmra.mxu1 %vm446_vm1, %v433_v44 }
 0x233   :  { %v470_v40 = vpop.f32.mrf.mxu1 }
 0x234   :  { %v471_v41 = vadd.f32 %v470_v40, %v439_v45 }
 0x236   :  { %vm476_vm2 = vcmp.ne.f32.partialorder %v471_v41, %v471_v41 }
 0x237   :  { %v478_v46 = vsel %vm476_vm2, 0.0, %v471_v41 }
 0x238   :  { %vm480_vm3 = vcmp.eq.f32.partialorder %v478_v46, inf }
 0x239   :  { %v482_v42 = vsel %vm480_vm3, 3.4028235e+38, %v478_v46 }
 0x23a   :  { %vm484_vm4 = vcmp.eq.f32.partialorder %v482_v42, -inf }
 0x23b   :  { %v486_v50 = vsel %vm484_vm4, -3.4028235e+38, %v482_v42  ;;  %v473_v51 = vpop.f32.mrf.mxu1 }
 0x23c   :  { %488 = vst [vmem:[%s740_s7] sm:$0xff] %v486_v50  ;;  %v474_v52 = vadd.f32 %v473_v51, %v444_v43 }
 0x23e   :  { %vm477_vm5 = vcmp.ne.f32.partialorder %v474_v52, %v474_v52 }
 0x23f   :  { %v479_v56 = vsel %vm477_vm5, 0.0, %v474_v52 }
 0x240   :  { %vm481_vm6 = vcmp.eq.f32.partialorder %v479_v56, inf }
 0x241   :  { %v483_v57 = vsel %vm481_vm6, 3.4028235e+38, %v479_v56 }
 0x242   :  { %vm485_vm7 = vcmp.eq.f32.partialorder %v483_v57, -inf }
 0x243   :  { %v487_v58 = vsel %vm485_vm7, -3.4028235e+38, %v483_v57 }
 0x244   :  { %489 = vst [vmem:[%s740_s7 + $0x8] sm:$0xff] %v487_v58 }

</bundles_post_ra>
